<compile_context>
chip_gen: v7x
topology: tpu7x:2x2x1
jax: 0.10.0
libtpu: 0.0.40
codegen_flags: <defaults>
</compile_context>

<pallas_src>
import numpy as np
import jax
import jax.numpy as jnp
from jax import lax
from jax.experimental import pallas as pl
from jax.experimental.pallas import tpu as pltpu


def random_triplets(n):
    """Deterministic re-implementation of MyTripletLossFunc.random_triplets."""
    rng = np.random.RandomState(0)
    labels = list(range(n // 2)) + list(range(n // 2))
    triplets = []
    for i in range(len(labels)):
        triplets_i = []
        for j in range(len(labels)):
            if labels[i] == labels[j] and i != j:
                for k in range(len(labels)):
                    if labels[i] != labels[k]:
                        triplets_i.append([i, j, k])
        rng.shuffle(triplets_i)
        triplets += triplets_i[:3]
    assert triplets and len(triplets) < 2000
    return np.asarray(triplets, dtype=np.int32)  # (T, 3)


def _make_triplet_loss_kernel(num_triplets):
    inv_count = 1.0 / float(num_triplets)

    def kernel(x_ref, ii_ref, jj_ref, kk_ref, loss_ref):
        x = x_ref[...].astype(jnp.float32)                       # (N, D)
        n = x_ref.shape[0]
        t = ii_ref.shape[0]

        # gram[a, b] = <x[a], x[b]>.  Contract D on both operands so the MXU
        # consumes the transposed-contraction form directly (no x.T temp).
        gram = lax.dot_general(
            x, x, dimension_numbers=(((1,), (1,)), ((), ())),
            preferred_element_type=jnp.float32)                  # (N, N)

        # Build one-hot selection masks in-kernel from (T, 1) int32 indices.
        lane = lax.broadcasted_iota(jnp.int32, (t, n), 1)        # (T, N)
        pi = (lane == ii_ref[...]).astype(jnp.float32)           # anchors
        pj = (lane == jj_ref[...]).astype(jnp.float32)           # positives
        pk = (lane == kk_ref[...]).astype(jnp.float32)           # negatives

        # Gather the gram rows we need (MXU): rows_i[t, :] = gram[i_t, :].
        rows_i = jnp.dot(pi, gram, preferred_element_type=jnp.float32)
        rows_j = jnp.dot(pj, gram, preferred_element_type=jnp.float32)
        rows_k = jnp.dot(pk, gram, preferred_element_type=jnp.float32)

        # ||x_a||^2 = gram[a, a]; dist[a, b] = gram[a,a] + gram[b,b] - 2*gram[a,b].
        # No (N, N) dist matrix is materialized — only (T, 1) gathers.
        xn_i = jnp.sum(rows_i * pi, axis=1, keepdims=True)       # (T, 1)
        xn_j = jnp.sum(rows_j * pj, axis=1, keepdims=True)
        xn_k = jnp.sum(rows_k * pk, axis=1, keepdims=True)
        g_ij = jnp.sum(rows_i * pj, axis=1, keepdims=True)
        g_ik = jnp.sum(rows_i * pk, axis=1, keepdims=True)

        # clamp(dist, 0, inf) applied to the gathered distances only (exact
        # parity with the reference at (T,1) cost instead of (N,N)).
        d_ij = jnp.maximum(xn_i + xn_j - 2.0 * g_ij, 0.0)
        d_ik = jnp.maximum(xn_i + xn_k - 2.0 * g_ik, 0.0)

        # Numerically stable softplus(d_ij - d_ik).
        z = d_ij - d_ik
        losses = jnp.maximum(z, 0.0) + jnp.log(1.0 + jnp.exp(-jnp.abs(z)))

        loss_ref[0] = jnp.sum(losses) * inv_count                # SMEM scalar

    return kernel


def triplet_loss(x, triplets):
    """x: (N, D) float32 features; triplets: (T, 3) int32 host array."""
    n, d = x.shape
    t = triplets.shape[0]

    idx_i = jnp.asarray(triplets[:, 0:1], dtype=jnp.int32)       # (T, 1)
    idx_j = jnp.asarray(triplets[:, 1:2], dtype=jnp.int32)
    idx_k = jnp.asarray(triplets[:, 2:3], dtype=jnp.int32)

    kernel = _make_triplet_loss_kernel(t)

    loss = pl.pallas_call(
        kernel,
        out_shape=jax.ShapeDtypeStruct((1,), jnp.float32),
        grid=(1,),
        in_specs=[
            pl.BlockSpec((n, d), lambda i: (0, 0)),
            pl.BlockSpec((t, 1), lambda i: (0, 0)),
            pl.BlockSpec((t, 1), lambda i: (0, 0)),
            pl.BlockSpec((t, 1), lambda i: (0, 0)),
        ],
        out_specs=pl.BlockSpec(memory_space=pltpu.MemorySpace.SMEM),
        compiler_params=pltpu.CompilerParams(
            dimension_semantics=("arbitrary",)),
    )(x, idx_i, idx_j, idx_k)
    return loss  # shape (1,), matches torch.FloatTensor((loss,))


def _reference_loss(x_np, triplets):
    """Pure-numpy reference mirroring MyTripletLossFunc.forward."""
    x_norm = (x_np ** 2).sum(1).reshape(-1, 1)
    dist = x_norm + x_norm.reshape(1, -1) - 2.0 * x_np @ x_np.T
    dist = np.clip(dist, 0.0, np.inf)
    loss, cnt = 0.0, 0.0
    for i, j, k in triplets:
        cnt += 1.0
        loss += np.log(1 + np.exp(dist[i, j] - dist[i, k]))
    return np.float32(loss / cnt)


if __name__ == "__main__":
    # TODO(synk): the reference's np.random.shuffle triplet sampling is
    # host-side / data-independent; reproduced deterministically in Python
    # (seed 0) rather than inside the kernel.
    N, D = 8, 32   # N samples (must be even: two copies of each label), D feature dims
    key = jax.random.PRNGKey(0)
    x = jax.random.normal(key, (N, D), dtype=jnp.float32)

    triplets = random_triplets(N)          # (24, 3)
    out = triplet_loss(x, triplets)
    out = jax.block_until_ready(out)

    ref = _reference_loss(np.asarray(x), triplets)
    assert out.shape == (1,)
    assert np.allclose(np.asarray(out)[0], ref, rtol=1e-5, atol=1e-5), (out, ref)
    print("KERNEL_OK")
</pallas_src>

<mosaic_0001>
module attributes {stable_mosaic.version = 11 : i64} {
  func.func @kernel(%arg0: i32, %arg1: memref<8x32xf32, #tpu.memory_space<vmem>>, %arg2: memref<24x1xi32, #tpu.memory_space<vmem>>, %arg3: memref<24x1xi32, #tpu.memory_space<vmem>>, %arg4: memref<24x1xi32, #tpu.memory_space<vmem>>, %arg5: memref<1xf32, #tpu.memory_space<smem>>) attributes {dimension_semantics = [#tpu.dimension_semantics<arbitrary>], iteration_bounds = array<i64: 1>, scalar_prefetch = 0 : i64, scratch_operands = 0 : i64, tpu.core_type = #tpu.core_type<tc>, window_params = [{pipeline_mode = #tpu.pipeline_mode<synchronous>, transform_indices = @transform_0, window_bounds = array<i64: 8, 32>}, {pipeline_mode = #tpu.pipeline_mode<synchronous>, transform_indices = @transform_1, window_bounds = array<i64: 24, 1>}, {pipeline_mode = #tpu.pipeline_mode<synchronous>, transform_indices = @transform_2, window_bounds = array<i64: 24, 1>}, {pipeline_mode = #tpu.pipeline_mode<synchronous>, transform_indices = @transform_3, window_bounds = array<i64: 24, 1>}, {transform_indices = @transform_4, window_bounds = array<i64: 1>}]} {
    %c0 = arith.constant 0 : index
    %c0_0 = arith.constant 0 : index
    %0 = vector.load %arg1[%c0, %c0_0] : memref<8x32xf32, #tpu.memory_space<vmem>>, vector<8x32xf32>
    %cst = arith.constant dense<0.000000e+00> : vector<8x8xf32>
    %1 = tpu.matmul %0, %0, %cst {dimension_numbers = #tpu.dot_dimension_numbers<[1], [1], [0], [0], [0, 0, 1, 0], [], []>} : vector<8x32xf32>, vector<8x32xf32>, vector<8x8xf32> -> vector<8x8xf32>
    %2 = tpu.iota {dimensions = array<i32: 1>} : vector<24x8xi32>
    %c0_1 = arith.constant 0 : index
    %c0_2 = arith.constant 0 : index
    %3 = vector.load %arg2[%c0_1, %c0_2] : memref<24x1xi32, #tpu.memory_space<vmem>>, vector<24x1xi32>
    %4 = vector.broadcast %3 : vector<24x1xi32> to vector<24x8xi32>
    %5 = arith.cmpi eq, %2, %4 : vector<24x8xi32>
    %6 = arith.extui %5 : vector<24x8xi1> to vector<24x8xi32>
    %7 = arith.sitofp %6 : vector<24x8xi32> to vector<24x8xf32>
    %c0_3 = arith.constant 0 : index
    %c0_4 = arith.constant 0 : index
    %8 = vector.load %arg3[%c0_3, %c0_4] : memref<24x1xi32, #tpu.memory_space<vmem>>, vector<24x1xi32>
    %9 = vector.broadcast %8 : vector<24x1xi32> to vector<24x8xi32>
    %10 = arith.cmpi eq, %2, %9 : vector<24x8xi32>
    %11 = arith.extui %10 : vector<24x8xi1> to vector<24x8xi32>
    %12 = arith.sitofp %11 : vector<24x8xi32> to vector<24x8xf32>
    %c0_5 = arith.constant 0 : index
    %c0_6 = arith.constant 0 : index
    %13 = vector.load %arg4[%c0_5, %c0_6] : memref<24x1xi32, #tpu.memory_space<vmem>>, vector<24x1xi32>
    %14 = vector.broadcast %13 : vector<24x1xi32> to vector<24x8xi32>
    %15 = arith.cmpi eq, %2, %14 : vector<24x8xi32>
    %16 = arith.extui %15 : vector<24x8xi1> to vector<24x8xi32>
    %17 = arith.sitofp %16 : vector<24x8xi32> to vector<24x8xf32>
    %cst_7 = arith.constant dense<0.000000e+00> : vector<24x8xf32>
    %18 = tpu.matmul %7, %1, %cst_7 {dimension_numbers = #tpu.dot_dimension_numbers<[1], [0], [0], [1], [0, 0, 1, 1], [], []>} : vector<24x8xf32>, vector<8x8xf32>, vector<24x8xf32> -> vector<24x8xf32>
    %cst_8 = arith.constant dense<0.000000e+00> : vector<24x8xf32>
    %19 = tpu.matmul %12, %1, %cst_8 {dimension_numbers = #tpu.dot_dimension_numbers<[1], [0], [0], [1], [0, 0, 1, 1], [], []>} : vector<24x8xf32>, vector<8x8xf32>, vector<24x8xf32> -> vector<24x8xf32>
    %cst_9 = arith.constant dense<0.000000e+00> : vector<24x8xf32>
    %20 = tpu.matmul %17, %1, %cst_9 {dimension_numbers = #tpu.dot_dimension_numbers<[1], [0], [0], [1], [0, 0, 1, 1], [], []>} : vector<24x8xf32>, vector<8x8xf32>, vector<24x8xf32> -> vector<24x8xf32>
    %21 = arith.mulf %18, %7 : vector<24x8xf32>
    %cst_10 = arith.constant dense<0.000000e+00> : vector<24xf32>
    %22 = vector.multi_reduction <add>, %21, %cst_10 [1] : vector<24x8xf32> to vector<24xf32>
    %23 = vector.shape_cast %22 : vector<24xf32> to vector<24x1xf32>
    %24 = arith.mulf %19, %12 : vector<24x8xf32>
    %cst_11 = arith.constant dense<0.000000e+00> : vector<24xf32>
    %25 = vector.multi_reduction <add>, %24, %cst_11 [1] : vector<24x8xf32> to vector<24xf32>
    %26 = vector.shape_cast %25 : vector<24xf32> to vector<24x1xf32>
    %27 = arith.mulf %20, %17 : vector<24x8xf32>
    %cst_12 = arith.constant dense<0.000000e+00> : vector<24xf32>
    %28 = vector.multi_reduction <add>, %27, %cst_12 [1] : vector<24x8xf32> to vector<24xf32>
    %29 = vector.shape_cast %28 : vector<24xf32> to vector<24x1xf32>
    %30 = arith.mulf %18, %12 : vector<24x8xf32>
    %cst_13 = arith.constant dense<0.000000e+00> : vector<24xf32>
    %31 = vector.multi_reduction <add>, %30, %cst_13 [1] : vector<24x8xf32> to vector<24xf32>
    %32 = vector.shape_cast %31 : vector<24xf32> to vector<24x1xf32>
    %33 = arith.mulf %18, %17 : vector<24x8xf32>
    %cst_14 = arith.constant dense<0.000000e+00> : vector<24xf32>
    %34 = vector.multi_reduction <add>, %33, %cst_14 [1] : vector<24x8xf32> to vector<24xf32>
    %35 = vector.shape_cast %34 : vector<24xf32> to vector<24x1xf32>
    %36 = arith.addf %23, %26 : vector<24x1xf32>
    %cst_15 = arith.constant 2.000000e+00 : f32
    %37 = vector.broadcast %cst_15 : f32 to vector<24x1xf32>
    %38 = arith.mulf %37, %32 : vector<24x1xf32>
    %39 = arith.subf %36, %38 : vector<24x1xf32>
    %cst_16 = arith.constant 0.000000e+00 : f32
    %40 = vector.broadcast %cst_16 : f32 to vector<24x1xf32>
    %41 = arith.maximumf %39, %40 : vector<24x1xf32>
    %42 = arith.addf %23, %29 : vector<24x1xf32>
    %cst_17 = arith.constant 2.000000e+00 : f32
    %43 = vector.broadcast %cst_17 : f32 to vector<24x1xf32>
    %44 = arith.mulf %43, %35 : vector<24x1xf32>
    %45 = arith.subf %42, %44 : vector<24x1xf32>
    %cst_18 = arith.constant 0.000000e+00 : f32
    %46 = vector.broadcast %cst_18 : f32 to vector<24x1xf32>
    %47 = arith.maximumf %45, %46 : vector<24x1xf32>
    %48 = arith.subf %41, %47 : vector<24x1xf32>
    %cst_19 = arith.constant 0.000000e+00 : f32
    %49 = vector.broadcast %cst_19 : f32 to vector<24x1xf32>
    %50 = arith.maximumf %48, %49 : vector<24x1xf32>
    %51 = math.absf %48 : vector<24x1xf32>
    %cst_20 = arith.constant 0.000000e+00 : f32
    %52 = vector.broadcast %cst_20 : f32 to vector<24x1xf32>
    %53 = arith.subf %52, %51 : vector<24x1xf32>
    %54 = math.exp %53 : vector<24x1xf32>
    %cst_21 = arith.constant 1.000000e+00 : f32
    %55 = vector.broadcast %cst_21 : f32 to vector<24x1xf32>
    %56 = arith.addf %55, %54 : vector<24x1xf32>
    %57 = math.log %56 : vector<24x1xf32>
    %58 = arith.addf %50, %57 : vector<24x1xf32>
    %59 = vector.shape_cast %58 : vector<24x1xf32> to vector<1x24x1xf32>
    %cst_22 = arith.constant dense<0.000000e+00> : vector<1xf32>
    %60 = vector.multi_reduction <add>, %59, %cst_22 [1, 2] : vector<1x24x1xf32> to vector<1xf32>
    %61 = vector.shape_cast %60 : vector<1xf32> to vector<1x1x1xf32>
    %62 = vector.extract %61[0, 0, 0] : f32 from vector<1x1x1xf32>
    %cst_23 = arith.constant 0.0416666679 : f32
    %63 = arith.mulf %62, %cst_23 : f32
    %c0_24 = arith.constant 0 : index
    %64 = memref.load %arg5[%c0_24] : memref<1xf32, #tpu.memory_space<smem>>
    memref.store %63, %arg5[%c0_24] : memref<1xf32, #tpu.memory_space<smem>>
    return
  }
  func.func @transform_0(%arg0: i32) -> (i32, i32) {
    %c0_i32 = arith.constant 0 : i32
    %c0_i32_0 = arith.constant 0 : i32
    %c0_i32_1 = arith.constant 0 : i32
    return %c0_i32, %c0_i32_0 : i32, i32
  }
  func.func @transform_1(%arg0: i32) -> (i32, i32) {
    %c0_i32 = arith.constant 0 : i32
    %c0_i32_0 = arith.constant 0 : i32
    %c0_i32_1 = arith.constant 0 : i32
    return %c0_i32, %c0_i32_0 : i32, i32
  }
  func.func @transform_2(%arg0: i32) -> (i32, i32) {
    %c0_i32 = arith.constant 0 : i32
    %c0_i32_0 = arith.constant 0 : i32
    %c0_i32_1 = arith.constant 0 : i32
    return %c0_i32, %c0_i32_0 : i32, i32
  }
  func.func @transform_3(%arg0: i32) -> (i32, i32) {
    %c0_i32 = arith.constant 0 : i32
    %c0_i32_0 = arith.constant 0 : i32
    %c0_i32_1 = arith.constant 0 : i32
    return %c0_i32, %c0_i32_0 : i32, i32
  }
  func.func @transform_4(%arg0: i32) -> i32 {
    %c0_i32 = arith.constant 0 : i32
    %c0_i32_0 = arith.constant 0 : i32
    return %c0_i32 : i32
  }
}

</mosaic_0001>

<bundles_post_ra>
// kernel: tpu_custom_call.1
= control target key start
LH: loop header
LB: loop body
LE: loop exit
PB: predicated region body
PF: predicated region fallthrough
CT: control target
= control target key end

     0   :  { %vm19_vm0 = vcmask 261120   ;;  %v675_v2 = vmov 0.0   ;;  %vm676_vm1 = vmmov 0   ;;  %v677_v4 = vmov 0   ;;  %s810_s0 = inlined_call_operand.vmem [shape: f32[8,32], index: 0, kind: input, shape index: {}]   ;;  %s811_s1 = inlined_call_operand.vmem [shape: s32[24,1], index: 1, kind: input, shape index: {}]   ;;  %s812_s2 = inlined_call_operand.vmem [shape: s32[24,1], index: 2, kind: input, shape index: {}]   ;;  %s813_s3 = inlined_call_operand.vmem [shape: s32[24,1], index: 3, kind: input, shape index: {}]   ;;  %s814_s4 = inlined_call_operand.hbm [shape: f32[1], index: 4, kind: output, shape index: {}]  }
   0x1   :  { %v18_v0 = vld [vmem:[%s810_s0] sm:$0xff]  ;;  %v97_v1 = vld [vmem:[%s811_s1 + $0x10] sm:$0xff]  ;;  %605 = vmatprep.subr.mxu0 %v675_v2  ;;  %607 = vmatprep.mubr.msk.f32.mxu0 %vm676_vm1, %v675_v2 }
   0x2   :  { %v95_v3 = vld [vmem:[%s811_s1] sm:$0xff]  ;;  %606 = vmatpush3.xpose.msk.msra.mxu0 %vm19_vm0, %v18_v0  ;;  %650 = vset.pattern.permute.xlu1 %v677_v4 }
   0x3   :  { %105 = vperm.xlu1 %650, %v97_v1   ;;  %649 = vset.pattern.permute.xlu0 %v677_v4 }
   0x4   :  { %9 = vsyncpa [#allocation3], 0  ;;  %v116_v5 = vld [vmem:[%s812_s2] sm:$0xff]  ;;  %99 = vperm.xlu0 %649, %v95_v3   ;;  %610 = vmatprep.subr.mxu1 %v675_v2  ;;  %v96_v6 = vld [vmem:[%s811_s1 + $0x8] sm:$0xff]  ;;  %v93_v13 = vlaneseq  ;;  %vm158_vm4 = vcmask 64512   ;;  %vm540_vm12 = vcmask 7168  }
   0x5   :  { %608 = vmatmul.mubr.msk.f32.vlgmr.msra.gmra.mrb[0].mxu0 %vm19_vm0, %v18_v0  ;;  %621 = vmatprep.subr.mxu0 %v675_v2  ;;  %v117_v7 = vld [vmem:[%s812_s2 + $0x8] sm:$0xff]  ;;  %v137_v8 = vld [vmem:[%s813_s3] sm:$0xff]  ;;  %v118_v9 = vld [vmem:[%s812_s2 + $0x10] sm:$0xff]  ;;  %s663_s9 = scalar_lea.hbm %s814_s4, 16 }
   0x6   :  { %612 = vmatprep.mubr.msk.f32.mxu1 %vm676_vm1, %v675_v2  ;;  %623 = vmatprep.mubr.msk.f32.mxu0 %vm676_vm1, %v675_v2  ;;  %v138_v10 = vld [vmem:[%s813_s3 + $0x8] sm:$0xff]  ;;  %v139_v11 = vld [vmem:[%s813_s3 + $0x10] sm:$0xff]  ;;  %v94_v16 = vand.u32 127, %v93_v13  ;;  %p664_p0 = scmp.ne.s32.totalorder %s814_s4, %s663_s9  ;;  %p667_p1 = scmp.lt.u32.totalorder %s663_s9, %s814_s4 }
   0x7   :  { %120 = vperm.xlu1 %650, %v116_v5  }
   0x8   :  { %102 = vperm.xlu0 %649, %v96_v6   ;;  %p669_p2 = pnand %p667_p1, %p664_p0 }
   0xb   :  { %123 = vperm.xlu1 %650, %v117_v7  }
   0xc   :  { %141 = vperm.xlu0 %649, %v137_v8  }
   0xf   :  { %126 = vperm.xlu1 %650, %v118_v9  }
  0x10   :  { %144 = vperm.xlu0 %649, %v138_v10  }
  0x14   :  { %147 = vperm.xlu0 %649, %v139_v11  }
  0x82   :  { %v106_v12 = vpop.permute.xlu1 %105 }
  0x83   :  { %v100_v15 = vpop.permute.xlu0 %99  ;;  %vm109_vm7 = vcmp.eq.s32.totalorder %v94_v16, %v106_v12 }
  0x84   :  { %vm107_vm2 = vcmp.eq.s32.totalorder %v94_v16, %v100_v15  ;;  %v575_v27 = vsel %vm109_vm7, 1.0, %v675_v2 }
  0x85   :  { %v573_v19 = vsel %vm107_vm2, 1.0, %v675_v2 }
  0x86   :  { %v121_v14 = vpop.permute.xlu1 %120 }
  0x87   :  { %v103_v18 = vpop.permute.xlu0 %102  ;;  %vm128_vm3 = vcmp.eq.s32.totalorder %v94_v16, %v121_v14 }
  0x88   :  { %vm108_vm5 = vcmp.eq.s32.totalorder %v94_v16, %v103_v18  ;;  %v576_v21 = vsel %vm128_vm3, 1.0, %v675_v2 }
  0x89   :  { %v574_v23 = vsel %vm108_vm5, 1.0, %v675_v2 }
  0x8a   :  { %v124_v17 = vpop.permute.xlu1 %123 }
  0x8b   :  { %vm129_vm6 = vcmp.eq.s32.totalorder %v94_v16, %v124_v17  ;;  %v142_v25 = vpop.permute.xlu0 %141 }
  0x8c   :  { %v577_v26 = vsel %vm129_vm6, 1.0, %v675_v2  ;;  %vm149_vm9 = vcmp.eq.s32.totalorder %v94_v16, %v142_v25 }
  0x8d   :  { %v579_v30 = vsel %vm149_vm9, 1.0, %v675_v2 }
  0x8e   :  { %v127_v24 = vpop.permute.xlu1 %126 }
  0x8f   :  { %vm130_vm8 = vcmp.eq.s32.totalorder %v94_v16, %v127_v24  ;;  %v145_v29 = vpop.permute.xlu0 %144 }
  0x90   :  { %v764_v28 = vsel %vm130_vm8, 1.0, %v675_v2  ;;  %vm150_vm10 = vcmp.eq.s32.totalorder %v94_v16, %v145_v29 }
  0x91   :  { %v580_v32 = vsel %vm150_vm10, 1.0, %v675_v2 }
  0x93   :  { %v148_v31 = vpop.permute.xlu0 %147 }
  0x94   :  { %vm151_vm11 = vcmp.eq.s32.totalorder %v94_v16, %v148_v31 }
  0x95   :  { %v581_v33 = vsel %vm151_vm11, 1.0, %v675_v2 }
  0xd8   :  { %v89_v20 = vpop.f32.mrb[0].mxu0 }
  0xd9   :  { %v609_v22 = vpop.f32.mrb[1].mxu0  ;;  %611 = vmatpush3.msra.mxu1 %v89_v20  ;;  %622 = vmatpush3.msra.mxu0 %v89_v20 }
  0xda   :  { %613 = vmatmul.mubr.msk.f32.vlgmr.msra.gmra.mrb[0].mxu1 %vm158_vm4, %v573_v19  ;;  %624 = vmatmul.mubr.msk.f32.vlgmr.msra.gmra.mrb[2].mxu0 %vm158_vm4, %v576_v21 }
  0xdb   :  { %632 = vmatprep.subr.mxu1 %v675_v2  ;;  %615 = vmatprep.mubr.msk.f32.mxu1 %vm676_vm1, %v675_v2 }
  0xdc   :  { %633 = vmatpush3.msra.mxu1 %v89_v20  ;;  %626 = vmatprep.mubr.msk.f32.mxu0 %vm676_vm1, %v675_v2 }
  0xde   :  { %616 = vmatmul.mubr.msk.f32.gmra.mrb[2].mxu1 %vm158_vm4, %v574_v23  ;;  %627 = vmatmul.mubr.msk.f32.gmra.mrb[4].mxu0 %vm158_vm4, %v577_v26 }
  0xdf   :  { %618 = vmatprep.mubr.msk.f32.mxu1 %vm676_vm1, %v675_v2  ;;  %629 = vmatprep.mubr.msk.f32.mxu0 %vm676_vm1, %v675_v2 }
  0xe2   :  { %619 = vmatmul.mubr.msk.f32.gmra.mrb[4].mxu1 %vm158_vm4, %v575_v27  ;;  %630 = vmatmul.mubr.msk.f32.gmra.mrb[6].mxu0 %vm158_vm4, %v764_v28 }
  0xe3   :  { %634 = vmatprep.mubr.msk.f32.mxu1 %vm676_vm1, %v675_v2 }
  0xe6   :  { %635 = vmatmul.mubr.msk.f32.vlgmr.msra.gmra.mrb[6].mxu1 %vm158_vm4, %v579_v30 }
  0xe7   :  { %637 = vmatprep.mubr.msk.f32.mxu1 %vm676_vm1, %v675_v2 }
  0xea   :  { %638 = vmatmul.mubr.msk.f32.gmra.mrb[8].mxu1 %vm158_vm4, %v580_v32 }
  0xeb   :  { %640 = vmatprep.mubr.msk.f32.mxu1 %vm676_vm1, %v675_v2 }
  0xee   :  { %641 = vmatmul.mubr.msk.f32.gmra.mrb[10].mxu1 %vm158_vm4, %v581_v33 }
 0x1ad   :  { %v234_v34 = vpop.f32.mrb[0].mxu1  ;;  %v323_v35 = vpop.f32.mrb[2].mxu0 }
 0x1ae   :  { %v438_v36 = vmul.f32 %v576_v21, %v323_v35  ;;  %v625_v37 = vpop.f32.mrb[3].mxu0  ;;  %v614_v38 = vpop.f32.mrb[1].mxu1  ;;  %v426_v39 = vmul.f32 %v573_v19, %v234_v34  ;;  %v462_v42 = vmul.f32 %v576_v21, %v234_v34  ;;  %v474_v50 = vmul.f32 %v579_v30, %v234_v34 }
 0x1b0   :  { %v429_v40 = vsel %vm158_vm4, %v426_v39, 0.0  ;;  %v441_v41 = vsel %vm158_vm4, %v438_v36, 0.0  ;;  %v465_v48 = vsel %vm158_vm4, %v462_v42, 0.0  ;;  %v477_v56 = vsel %vm158_vm4, %v474_v50, 0.0 }
 0x1b1   :  { %430 = vadd.xlane.f32.xlu1 %v429_v40  ;;  %v239_v43 = vpop.f32.mrb[2].mxu1  ;;  %442 = vadd.xlane.f32.xlu0 %v441_v41  ;;  %v328_v44 = vpop.f32.mrb[4].mxu0 }
 0x1b2   :  { %v439_v45 = vmul.f32 %v577_v26, %v328_v44  ;;  %v628_v46 = vpop.f32.mrb[5].mxu0  ;;  %v617_v47 = vpop.f32.mrb[3].mxu1  ;;  %v463_v51 = vmul.f32 %v577_v26, %v239_v43  ;;  %v427_v58 = vmul.f32 %v574_v23, %v239_v43  ;;  %v475_v59 = vmul.f32 %v580_v32, %v239_v43 }
 0x1b4   :  { %v444_v49 = vsel %vm158_vm4, %v439_v45, 0.0  ;;  %v468_v57 = vsel %vm158_vm4, %v463_v51, 0.0  ;;  %v432_v63 = vsel %vm158_vm4, %v427_v58, 0.0  ;;  %v480_v0 = vsel %vm158_vm4, %v475_v59, 0.0 }
 0x1b5   :  { %v244_v52 = vpop.f32.mrb[4].mxu1  ;;  %466 = vadd.xlane.f32.xlu0 %v465_v48  ;;  %445 = vadd.xlane.f32.xlu1 %v444_v49  ;;  %v333_v53 = vpop.f32.mrb[6].mxu0 }
 0x1b6   :  { %v620_v54 = vpop.f32.mrb[5].mxu1  ;;  %v631_v55 = vpop.f32.mrb[7].mxu0  ;;  %v440_v62 = vmul.f32 %v764_v28, %v333_v53  ;;  %v428_v1 = vmul.f32 %v575_v27, %v244_v52  ;;  %v464_v13 = vmul.f32 %v764_v28, %v244_v52  ;;  %v476_v16 = vmul.f32 %v581_v33, %v244_v52 }
 0x1b8   :  { %v435_v6 = vsel %vm158_vm4, %v428_v1, 0.0  ;;  %v447_v7 = vsel %vm158_vm4, %v440_v62, 0.0  ;;  %v471_v15 = vsel %vm158_vm4, %v464_v13, 0.0  ;;  %v483_v17 = vsel %vm158_vm4, %v476_v16, 0.0 }
 0x1b9   :  { %v412_v60 = vpop.f32.mrb[6].mxu1  ;;  %478 = vadd.xlane.f32.xlu0 %v477_v56  ;;  %469 = vadd.xlane.f32.xlu1 %v468_v57 }
 0x1ba   :  { %v636_v61 = vpop.f32.mrb[7].mxu1  ;;  %v450_v4 = vmul.f32 %v579_v30, %v412_v60 }
 0x1bc   :  { %v453_v11 = vsel %vm158_vm4, %v450_v4, 0.0 }
 0x1bd   :  { %v417_v2 = vpop.f32.mrb[8].mxu1  ;;  %433 = vadd.xlane.f32.xlu0 %v432_v63  ;;  %481 = vadd.xlane.f32.xlu1 %v480_v0 }
 0x1be   :  { %v639_v3 = vpop.f32.mrb[9].mxu1  ;;  %v451_v5 = vmul.f32 %v580_v32, %v417_v2 }
 0x1c0   :  { %v456_v12 = vsel %vm158_vm4, %v451_v5, 0.0 }
 0x1c1   :  { %v422_v8 = vpop.f32.mrb[10].mxu1  ;;  %436 = vadd.xlane.f32.xlu0 %v435_v6  ;;  %448 = vadd.xlane.f32.xlu1 %v447_v7 }
 0x1c2   :  { %v642_v9 = vpop.f32.mrb[11].mxu1  ;;  %v452_v10 = vmul.f32 %v581_v33, %v422_v8 }
 0x1c4   :  { %v459_v14 = vsel %vm158_vm4, %v452_v10, 0.0 }
 0x1c5   :  { %454 = vadd.xlane.f32.xlu0 %v453_v11  ;;  %457 = vadd.xlane.f32.xlu1 %v456_v12 }
 0x1c9   :  { %460 = vadd.xlane.f32.xlu0 %v459_v14  ;;  %472 = vadd.xlane.f32.xlu1 %v471_v15 }
 0x1cd   :  { %484 = vadd.xlane.f32.xlu0 %v483_v17 }
 0x23e   :  { %v431_v18 = vpop.xlane.xlu1 %430  ;;  %v443_v19 = vpop.xlane.xlu0 %442 }
 0x23f   :  { %v486_v30 = vadd.f32 %v443_v19, %v431_v18 }
 0x242   :  { %v467_v20 = vpop.xlane.xlu0 %466  ;;  %v446_v21 = vpop.xlane.xlu1 %445 }
 0x243   :  { %v489_v26 = vmul.f32 2.0, %v467_v20 }
 0x245   :  { %v492_v32 = vsub.f32 %v486_v30, %v489_v26 }
 0x246   :  { %v479_v22 = vpop.xlane.xlu0 %478  ;;  %v470_v23 = vpop.xlane.xlu1 %469 }
 0x247   :  { %v490_v31 = vmul.f32 2.0, %v470_v23  ;;  %v501_v33 = vmul.f32 2.0, %v479_v22  ;;  %v495_v44 = vmax.f32 %v492_v32, 0.0 }
 0x24a   :  { %v434_v24 = vpop.xlane.xlu0 %433  ;;  %v482_v25 = vpop.xlane.xlu1 %481 }
 0x24b   :  { %v487_v29 = vadd.f32 %v446_v21, %v434_v24  ;;  %v502_v37 = vmul.f32 2.0, %v482_v25 }
 0x24d   :  { %v493_v36 = vsub.f32 %v487_v29, %v490_v31 }
 0x24e   :  { %v437_v27 = vpop.xlane.xlu0 %436  ;;  %v449_v28 = vpop.xlane.xlu1 %448 }
 0x24f   :  { %v496_v45 = vmax.f32 %v493_v36, 0.0  ;;  %v488_v51 = vadd.f32 %v449_v28, %v437_v27 }
 0x252   :  { %v455_v34 = vpop.xlane.xlu0 %454  ;;  %v458_v35 = vpop.xlane.xlu1 %457 }
 0x253   :  { %v498_v38 = vadd.f32 %v455_v34, %v431_v18  ;;  %v499_v39 = vadd.f32 %v458_v35, %v434_v24 }
 0x255   :  { %v504_v40 = vsub.f32 %v498_v38, %v501_v33  ;;  %v505_v41 = vsub.f32 %v499_v39, %v502_v37 }
 0x256   :  { %v461_v42 = vpop.xlane.xlu0 %460  ;;  %v473_v43 = vpop.xlane.xlu1 %472 }
 0x257   :  { %v507_v46 = vmax.f32 %v504_v40, 0.0  ;;  %v508_v47 = vmax.f32 %v505_v41, 0.0  ;;  %v491_v48 = vmul.f32 2.0, %v473_v43  ;;  %v500_v55 = vadd.f32 %v461_v42, %v437_v27 }
 0x259   :  { %v510_v49 = vsub.f32 %v495_v44, %v507_v46  ;;  %v511_v50 = vsub.f32 %v496_v45, %v508_v47  ;;  %v494_v56 = vsub.f32 %v488_v51, %v491_v48 }
 0x25a   :  { %v485_v52 = vpop.xlane.xlu0 %484 }
 0x25b   :  { %v516_v53 = vand.u32 2147483647, %v510_v49  ;;  %v517_v54 = vand.u32 2147483647, %v511_v50  ;;  %v503_v57 = vmul.f32 2.0, %v485_v52  ;;  %v497_v63 = vmax.f32 %v494_v56, 0.0 }
 0x25c   :  { %v513_v15 = vmax.f32 %v510_v49, 0.0  ;;  %v514_v16 = vmax.f32 %v511_v50, 0.0 }
 0x25d   :  { %v519_v58 = vsub.f32 0.0, %v516_v53  ;;  %v520_v59 = vsub.f32 0.0, %v517_v54  ;;  %v506_v60 = vsub.f32 %v500_v55, %v503_v57 }
 0x25f   :  { %v522_v61 = vmul.f32 1.442695, %v519_v58  ;;  %v524_v62 = vmul.f32 1.442695, %v520_v59  ;;  %v509_v0 = vmax.f32 %v506_v60, 0.0 }
 0x261   :  { %651 = vpow2.f32 %v522_v61  ;;  %v512_v1 = vsub.f32 %v497_v63, %v509_v0 }
 0x262   :  { %653 = vpow2.f32 %v524_v62 }
 0x263   :  { %v518_v2 = vand.u32 2147483647, %v512_v1  ;;  %v515_v20 = vmax.f32 %v512_v1, 0.0 }
 0x265   :  { %v521_v3 = vsub.f32 0.0, %v518_v2 }
 0x267   :  { %v526_v4 = vmul.f32 1.442695, %v521_v3 }
 0x269   :  { %655 = vpow2.f32 %v526_v4 }
 0x26b   :  { %v652_v5 = vpop.eup %651 }
 0x26c   :  { %v654_v6 = vpop.eup %653  ;;  %v528_v7 = vadd.f32 1.0, %v652_v5 }
 0x26d   :  { %v529_v8 = vadd.f32 1.0, %v654_v6 }
 0x26e   :  { %657 = vlog2.f32 %v528_v7 }
 0x26f   :  { %659 = vlog2.f32 %v529_v8 }
 0x273   :  { %v656_v9 = vpop.eup %655 }
 0x274   :  { %v530_v10 = vadd.f32 1.0, %v656_v9 }
 0x276   :  { %661 = vlog2.f32 %v530_v10 }
 0x278   :  { %v658_v11 = vpop.eup %657 }
 0x279   :  { %v660_v12 = vpop.eup %659  ;;  %v532_v13 = vmul.f32 0.6931472, %v658_v11 }
 0x27a   :  { %v534_v14 = vmul.f32 0.6931472, %v660_v12 }
 0x27b   :  { %v537_v17 = vadd.f32 %v532_v13, %v513_v15 }
 0x27c   :  { %v538_v18 = vadd.f32 %v534_v14, %v514_v16 }
 0x27d   :  { %v541_v22 = vsel %vm540_vm12, %v537_v17, 0.0 }
 0x27e   :  { %v542_v23 = vsel %vm540_vm12, %v538_v18, 0.0 }
 0x27f   :  { %v543_v25 = vadd.f32 %v542_v23, %v541_v22 }
 0x280   :  { %v662_v19 = vpop.eup %661 }
 0x281   :  { %v536_v21 = vmul.f32 0.6931472, %v662_v19 }
 0x283   :  { %v539_v24 = vadd.f32 %v536_v21, %v515_v20 }
 0x285   :  { %v544_v26 = vsel %vm540_vm12, %v539_v24, 0.0 }
 0x286   :  { %v545_v27 = vadd.f32 %v544_v26, %v543_v25 }
 0x288   :  { %546 = vadd.xlane.f32.xlu1 %v545_v27 }
 0x315   :  { %v547_v28 = vpop.xlane.xlu1 %546 }
 0x316   :  { %v548_v29 = vrot.slane %v547_v28, 4 }
 0x318   :  { %v549_v30 = vadd.f32 %v548_v29, %v547_v28 }
 0x31a   :  { %v550_v31 = vrot.slane %v549_v30, 2 }
 0x31c   :  { %v551_v32 = vadd.f32 %v550_v31, %v549_v30 }
 0x31e   :  { %v552_v33 = vrot.slane %v551_v32, 1 }
 0x320   :  { %v553_v34 = vadd.f32 %v552_v33, %v551_v32 }
 0x322   :  { %643 = vpush %v553_v34 }
 0x353   :  { %s644_s2 = spop %643 }
 0x354   :  { %s555_s3 = smul.f32 0.041666668, %s644_s2 }
 0x356   :  { %557 = sst [smem:[#allocation2]] %s555_s3 }
 0x357   :  { %672 = shalt.err (!%p669_p2)
}
 0x358   :  { %s678_s14 = smov [#allocation2]  }
 0x359   :  { %565 = dma.smem_to_hbm %s678_s14, 16, %s814_s4, [#allocation3]  }
 0x35a   :  { %673 = dma.done.wait [#allocation3], 16  }
 0x35b   :  { %674 = vsyncadd [#allocation3], 4294967280 }
 0x35c   :  { %569 = sfence }
 0x35d   :  { %570 = vsyncpa [#allocation3], 1 }

</bundles_post_ra>
